<compile_context>
chip_gen: v7x
topology: tpu7x:2x2x1
jax: 0.10.0
libtpu: 0.0.40
codegen_flags: <defaults>
</compile_context>

<pallas_src>
import functools

import jax
import jax.numpy as jnp
from jax import lax
from jax.experimental import pallas as pl
from jax.experimental.pallas import tpu as pltpu

_SUBLANE = 8    # f32 sublane tile
_LANE = 128     # lane tile
_WORKING_MAPS = 14  # ~peak live f32 (H, W) intermediates inside _ssim_map


def _use_roll(n, tile):
    # Conservative gate: full-extent pltpu.roll accumulation only when the
    # axis is tile aligned; otherwise use valid-extent slice accumulation.
    return n % tile == 0


def _map_extents(n_rows, n_cols, win_size):
    """Shape of the SSIM map produced by _ssim_map for an (n_rows, n_cols) slab."""
    r_out = n_rows if _use_roll(n_rows, _SUBLANE) else n_rows - win_size + 1
    c_out = n_cols if _use_roll(n_cols, _LANE) else n_cols - win_size + 1
    return r_out, c_out


def _ssim_map(x, y, *, win_size, data_range):
    """SSIM map over window anchors for one f32 (R, C) slab.

    The separable uniform window sum is computed per axis either as
    pltpu.roll-shifted accumulation over the full extent (tile-aligned axes;
    wrapped anchors must be masked by the caller) or as valid-extent slice
    accumulation (ragged axes).  Output shape == _map_extents(R, C, win_size).
    """
    np_win = float(win_size * win_size)
    inv_np = 1.0 / np_win
    cov_norm = np_win / (np_win - 1.0)          # sample covariance (skimage)
    c1 = (0.01 * data_range) ** 2
    c2 = (0.03 * data_range) ** 2

    def win_sum(a):
        for axis, tile in ((0, _SUBLANE), (1, _LANE)):
            n = a.shape[axis]
            if _use_roll(n, tile):
                acc = a
                for d in range(1, win_size):
                    # shift = n - d  ==  jnp.roll(a, -d):  acc[i] += a[i + d]
                    acc = acc + pltpu.roll(a, n - d, axis=axis)
            else:
                nv = n - win_size + 1

                def sl(s):
                    if axis == 0:
                        return (slice(s, s + nv), slice(None))
                    return (slice(None), slice(s, s + nv))

                acc = a[sl(0)]
                for d in range(1, win_size):
                    acc = acc + a[sl(d)]
            a = acc
        return a

    # Products hoisted out of the window sums (3 muls, not 3 * win^2).
    sx, sy = win_sum(x), win_sum(y)
    sxx, syy, sxy = win_sum(x * x), win_sum(y * y), win_sum(x * y)

    ux = sx * inv_np
    uy = sy * inv_np
    vx = cov_norm * (sxx * inv_np - ux * ux)
    vy = cov_norm * (syy * inv_np - uy * uy)
    vxy = cov_norm * (sxy * inv_np - ux * uy)

    a1 = 2.0 * ux * uy + c1
    a2 = 2.0 * vxy + c2
    b1 = ux * ux + uy * uy + c1
    b2 = vx + vy + c2
    denom = b1 * b2
    # EUP reciprocal seed (otherwise idle slot) + one Newton step to recover
    # full f32 accuracy (approx alone is ~1e-3 rel).
    inv = pl.reciprocal(denom, approx=True)
    inv = inv * (2.0 - denom * inv)
    return (a1 * a2) * inv


def _ssim_group_kernel(x_ref, y_ref, out_ref, *, win_size, data_range):
    # x_ref / y_ref: (spg, H, W) block of (batch*channel) image slabs.
    # out_ref: (1, 8, 128) lane-dense block holding this group's partial sum.
    spg, H, W = x_ref.shape
    hv = H - win_size + 1
    wv = W - win_size + 1

    # Validity mask over window anchors (hoisted out of the slab loop):
    # anchors whose window runs past the slab edge (or wraps, in the
    # roll-based sums) contribute zero.
    r_out, c_out = _map_extents(H, W, win_size)
    ri = lax.broadcasted_iota(jnp.int32, (r_out, c_out), 0)
    ci = lax.broadcasted_iota(jnp.int32, (r_out, c_out), 1)
    valid = ((ri < hv) & (ci < wv)).astype(jnp.float32)

    def body(i, tot):
        # One slab at a time keeps the f32 working set to ~O(H*W) regardless
        # of group size, so the pipelined input block can be much larger.
        x = x_ref[i].astype(jnp.float32)
        y = y_ref[i].astype(jnp.float32)
        s = _ssim_map(x, y, win_size=win_size, data_range=data_range)
        return tot + jnp.sum(s * valid, keepdims=True)

    total = lax.fori_loop(0, spg, body, jnp.zeros((1, 1), jnp.float32))
    out_ref[...] = jnp.full(out_ref.shape, total[0, 0], dtype=jnp.float32)


def _ssim_halo_kernel(x_hbm, y_hbm, out_ref, xbuf, ybuf, sem,
                      *, win_size, data_range, band_rows, H, W):
    # Fallback for slabs too large for VMEM: grid = (slab, band).  Each step
    # DMAs band_rows + win_size - 1 rows (a win_size-1 row halo) of one slab
    # into VMEM and reduces that band's SSIM partial sum.
    # TODO(synk): double-buffer the band DMAs to overlap with compute.
    n = pl.program_id(0)
    b = pl.program_id(1)
    hv = H - win_size + 1
    wv = W - win_size + 1
    rows = band_rows + win_size - 1
    start = jnp.minimum(b * band_rows, H - rows)   # clamp last band in-bounds

    cx = pltpu.make_async_copy(x_hbm.at[n, pl.ds(start, rows), :], xbuf, sem.at[0])
    cy = pltpu.make_async_copy(y_hbm.at[n, pl.ds(start, rows), :], ybuf, sem.at[1])
    cx.start()
    cy.start()
    cx.wait()
    cy.wait()

    x = xbuf[...].astype(jnp.float32)
    y = ybuf[...].astype(jnp.float32)
    s = _ssim_map(x, y, win_size=win_size, data_range=data_range)

    r_out, c_out = s.shape
    ri = lax.broadcasted_iota(jnp.int32, (r_out, c_out), 0)
    ci = lax.broadcasted_iota(jnp.int32, (r_out, c_out), 1)
    g = start + ri                                  # global output-row index
    valid = ((ri < band_rows) & (g >= b * band_rows) & (g < hv)
             & (ci < wv)).astype(jnp.float32)
    out_ref[...] = jnp.full(out_ref.shape, jnp.sum(s * valid), dtype=jnp.float32)


def _vmem_budget_bytes():
    """(per-step block budget, vmem_limit_bytes) scaled to this TPU generation."""
    try:
        cap = int(pltpu.get_tpu_info().vmem_capacity_bytes)
    except Exception:  # no TPU info available -> assume the smallest (v7x)
        cap = 64 * 1024 * 1024
    budget = int(cap * 0.45)                        # ~29 MiB v7x / ~58 MiB v5e,v6e
    limit = min(int(cap * 0.8), cap - (12 << 20))   # ~52 MiB v7x / ~102 MiB v5e,v6e
    return budget, limit


def _choose_slabs_per_group(n_slabs, H, W, itemsize, budget):
    per_slab = 4 * H * W * itemsize                 # 2 inputs x double-buffered
    working = _WORKING_MAPS * H * W * 4             # per-slab f32 intermediates
    divisors = [d for d in range(1, n_slabs + 1) if n_slabs % d == 0]
    fits = [d for d in divisors if d * per_slab + working <= budget]
    if not fits:
        return None                                 # -> H-banded halo fallback
    # Prefer >= 2 grid steps so a 2-TensorCore chip (v7x) can shard the
    # "parallel" grid axis; on 1-TC chips this costs one extra ~0.35us step.
    two_plus = [d for d in fits if n_slabs // d >= 2]
    return max(two_plus) if two_plus else max(fits)


def _choose_band_rows(H, W, win_size, itemsize, budget):
    hv = H - win_size + 1
    per_row = W * (2 * itemsize + _WORKING_MAPS * 4)
    rows = max(budget // per_row, win_size)
    band = max(int(rows) - (win_size - 1), 1)
    if band > _SUBLANE:
        band = (band // _SUBLANE) * _SUBLANE
    # TODO(synk): extremely wide rows (one padded row > budget) would also
    # need W-tiling; not implemented.
    return min(band, hv)


def ssim_loss(img1, img2, win_size=3, data_range=1.0):
    """1 - mean SSIM over the batch (float32 scalar), skimage semantics."""
    assert img1.shape == img2.shape and img1.ndim == 4
    B, C, H, W = img1.shape
    assert win_size % 2 == 1 and win_size <= H and win_size <= W

    hv = H - win_size + 1
    wv = W - win_size + 1
    n_slabs = B * C
    itemsize = jnp.dtype(img1.dtype).itemsize

    # Free reshape (no transpose, no extra HBM traffic): every (b, c) slab is
    # already a contiguous (H, W) image.
    # TODO(synk): for very narrow images (W << 128) a lane-packed (H, n*W)
    # layout would refill the 128-wide lanes, but it costs a full HBM
    # transpose of both inputs; dropped in favour of the transpose-free path.
    x3 = img1.reshape(n_slabs, H, W)
    y3 = img2.reshape(n_slabs, H, W)

    budget, vmem_limit = _vmem_budget_bytes()
    spg = _choose_slabs_per_group(n_slabs, H, W, itemsize, budget)

    if spg is not None:
        num_groups = n_slabs // spg
        kernel = functools.partial(
            _ssim_group_kernel, win_size=win_size, data_range=float(data_range))
        partials = pl.pallas_call(
            kernel,
            out_shape=jax.ShapeDtypeStruct((num_groups, 8, 128), jnp.float32),
            grid=(num_groups,),
            in_specs=[pl.BlockSpec((spg, H, W), lambda g: (g, 0, 0)),
                      pl.BlockSpec((spg, H, W), lambda g: (g, 0, 0))],
            out_specs=pl.BlockSpec((1, 8, 128), lambda g: (g, 0, 0)),
            compiler_params=pltpu.CompilerParams(
                dimension_semantics=("parallel",),
                vmem_limit_bytes=vmem_limit),
        )(x3, y3)
        total = jnp.sum(partials[:, 0, 0])
    else:
        # Slab too large for VMEM: band the rows with a (win_size-1) halo and
        # DMA the bands manually (BlockSpec cannot express overlapping blocks).
        band_rows = _choose_band_rows(H, W, win_size, itemsize, budget)
        rows = band_rows + win_size - 1
        n_bands = -(-hv // band_rows)
        kernel = functools.partial(
            _ssim_halo_kernel, win_size=win_size, data_range=float(data_range),
            band_rows=band_rows, H=H, W=W)
        partials = pl.pallas_call(
            kernel,
            out_shape=jax.ShapeDtypeStruct((n_slabs, n_bands, 8, 128),
                                           jnp.float32),
            grid=(n_slabs, n_bands),
            in_specs=[pl.BlockSpec(memory_space=pl.ANY),
                      pl.BlockSpec(memory_space=pl.ANY)],
            out_specs=pl.BlockSpec((1, 1, 8, 128), lambda n, b: (n, b, 0, 0)),
            scratch_shapes=[pltpu.VMEM((rows, W), img1.dtype),
                            pltpu.VMEM((rows, W), img2.dtype),
                            pltpu.SemaphoreType.DMA((2,))],
            compiler_params=pltpu.CompilerParams(
                dimension_semantics=("parallel", "arbitrary"),
                vmem_limit_bytes=vmem_limit),
        )(x3, y3)
        total = jnp.sum(partials[:, :, 0, 0])

    n_valid = float(n_slabs * hv * wv)
    # All (b, c) slabs have equal valid-pixel counts, so the global mean over
    # valid pixels equals skimage's per-channel / per-batch averaged SSIM.
    # TODO(synk): PyTorch path returns a float64 0-dim tensor (numpy mean);
    # we return float32, the natural TPU dtype.
    return (1.0 - total / n_valid).astype(jnp.float32)


def _ssim_loss_reference(img1, img2, win_size=3, data_range=1.0):
    """Pure-JAX reference (same skimage math) used as a sanity check."""
    x = img1.astype(jnp.float32)
    y = img2.astype(jnp.float32)
    H, W = x.shape[-2:]
    hv = H - win_size + 1
    wv = W - win_size + 1
    np_win = float(win_size * win_size)
    cov_norm = np_win / (np_win - 1.0)
    c1 = (0.01 * data_range) ** 2
    c2 = (0.03 * data_range) ** 2

    def wsum(a):
        out = jnp.zeros(a.shape[:-2] + (hv, wv), jnp.float32)
        for di in range(win_size):
            for dj in range(win_size):
                out = out + a[..., di:di + hv, dj:dj + wv]
        return out

    ux = wsum(x) / np_win
    uy = wsum(y) / np_win
    vx = cov_norm * (wsum(x * x) / np_win - ux * ux)
    vy = cov_norm * (wsum(y * y) / np_win - uy * uy)
    vxy = cov_norm * (wsum(x * y) / np_win - ux * uy)
    s = ((2 * ux * uy + c1) * (2 * vxy + c2)) / (
        (ux * ux + uy * uy + c1) * (vx + vy + c2))
    return 1.0 - jnp.mean(s)


if __name__ == "__main__":
    key = jax.random.PRNGKey(0)
    k1, k2 = jax.random.split(key)
    # Images in [0, 1] consistent with data_range=1.0.
    img1 = jax.random.uniform(k1, (2, 4, 16, 16), dtype=jnp.float32)
    img2 = jnp.clip(
        img1 + 0.1 * jax.random.normal(k2, (2, 4, 16, 16), dtype=jnp.float32),
        0.0,
        1.0,
    )

    loss = jax.block_until_ready(ssim_loss(img1, img2, win_size=3))
    ref = jax.block_until_ready(_ssim_loss_reference(img1, img2, win_size=3))
    assert loss.shape == () and bool(jnp.isfinite(loss))
    assert abs(float(loss) - float(ref)) < 2e-3, (float(loss), float(ref))
    print("KERNEL_OK")
</pallas_src>

<mosaic_0001>
module attributes {stable_mosaic.version = 11 : i64} {
  func.func @_ssim_group_kernel(%arg0: i32, %arg1: memref<4x16x16xf32, #tpu.memory_space<vmem>>, %arg2: memref<4x16x16xf32, #tpu.memory_space<vmem>>, %arg3: memref<1x8x128xf32, #tpu.memory_space<vmem>>) attributes {dimension_semantics = [#tpu.dimension_semantics<parallel>], iteration_bounds = array<i64: 2>, scalar_prefetch = 0 : i64, scratch_operands = 0 : i64, tpu.core_type = #tpu.core_type<tc>, window_params = [{transform_indices = @transform_0, window_bounds = array<i64: 4, 16, 16>}, {transform_indices = @transform_1, window_bounds = array<i64: 4, 16, 16>}, {transform_indices = @transform_2, window_bounds = array<i64: 1, 8, 128>}]} {
    %0 = tpu.iota {dimensions = array<i32: 0>} : vector<16x14xi32>
    %1 = tpu.iota {dimensions = array<i32: 1>} : vector<16x14xi32>
    %c14_i32 = arith.constant 14 : i32
    %2 = vector.broadcast %c14_i32 : i32 to vector<16x14xi32>
    %3 = arith.cmpi slt, %0, %2 : vector<16x14xi32>
    %c14_i32_0 = arith.constant 14 : i32
    %4 = vector.broadcast %c14_i32_0 : i32 to vector<16x14xi32>
    %5 = arith.cmpi slt, %1, %4 : vector<16x14xi32>
    %6 = arith.andi %3, %5 : vector<16x14xi1>
    %7 = arith.extui %6 : vector<16x14xi1> to vector<16x14xi32>
    %8 = arith.sitofp %7 : vector<16x14xi32> to vector<16x14xf32>
    %cst = arith.constant 0.000000e+00 : f32
    %9 = vector.broadcast %cst : f32 to vector<1x1xf32>
    %c0_i32 = arith.constant 0 : i32
    %c4_i32 = arith.constant 4 : i32
    %10 = arith.addi %c0_i32, %c4_i32 : i32
    %c1_i32 = arith.constant 1 : i32
    %11 = scf.for %arg4 = %c0_i32 to %10 step %c1_i32 iter_args(%arg5 = %9) -> (vector<1x1xf32>)  : i32 {
      %15 = arith.index_cast %arg4 : i32 to index
      %c0_4 = arith.constant 0 : index
      %c0_5 = arith.constant 0 : index
      %16 = vector.load %arg1[%15, %c0_4, %c0_5] : memref<4x16x16xf32, #tpu.memory_space<vmem>>, vector<1x16x16xf32>
      %17 = vector.shape_cast %16 : vector<1x16x16xf32> to vector<16x16xf32>
      %18 = arith.index_cast %arg4 : i32 to index
      %c0_6 = arith.constant 0 : index
      %c0_7 = arith.constant 0 : index
      %19 = vector.load %arg2[%18, %c0_6, %c0_7] : memref<4x16x16xf32, #tpu.memory_space<vmem>>, vector<1x16x16xf32>
      %20 = vector.shape_cast %19 : vector<1x16x16xf32> to vector<16x16xf32>
      %c15_i32 = arith.constant 15 : i32
      %21 = tpu.dynamic_rotate %17 by %c15_i32 dim 0 : vector<16x16xf32>, i32 -> vector<16x16xf32>
      %22 = arith.addf %17, %21 : vector<16x16xf32>
      %c14_i32_8 = arith.constant 14 : i32
      %23 = tpu.dynamic_rotate %17 by %c14_i32_8 dim 0 : vector<16x16xf32>, i32 -> vector<16x16xf32>
      %24 = arith.addf %22, %23 : vector<16x16xf32>
      %25 = vector.extract_strided_slice %24 {offsets = [0, 0], sizes = [16, 14], strides = [1, 1]} : vector<16x16xf32> to vector<16x14xf32>
      %26 = vector.extract_strided_slice %24 {offsets = [0, 1], sizes = [16, 14], strides = [1, 1]} : vector<16x16xf32> to vector<16x14xf32>
      %27 = arith.addf %25, %26 : vector<16x14xf32>
      %28 = vector.extract_strided_slice %24 {offsets = [0, 2], sizes = [16, 14], strides = [1, 1]} : vector<16x16xf32> to vector<16x14xf32>
      %29 = arith.addf %27, %28 : vector<16x14xf32>
      %c15_i32_9 = arith.constant 15 : i32
      %30 = tpu.dynamic_rotate %20 by %c15_i32_9 dim 0 : vector<16x16xf32>, i32 -> vector<16x16xf32>
      %31 = arith.addf %20, %30 : vector<16x16xf32>
      %c14_i32_10 = arith.constant 14 : i32
      %32 = tpu.dynamic_rotate %20 by %c14_i32_10 dim 0 : vector<16x16xf32>, i32 -> vector<16x16xf32>
      %33 = arith.addf %31, %32 : vector<16x16xf32>
      %34 = vector.extract_strided_slice %33 {offsets = [0, 0], sizes = [16, 14], strides = [1, 1]} : vector<16x16xf32> to vector<16x14xf32>
      %35 = vector.extract_strided_slice %33 {offsets = [0, 1], sizes = [16, 14], strides = [1, 1]} : vector<16x16xf32> to vector<16x14xf32>
      %36 = arith.addf %34, %35 : vector<16x14xf32>
      %37 = vector.extract_strided_slice %33 {offsets = [0, 2], sizes = [16, 14], strides = [1, 1]} : vector<16x16xf32> to vector<16x14xf32>
      %38 = arith.addf %36, %37 : vector<16x14xf32>
      %39 = arith.mulf %17, %17 : vector<16x16xf32>
      %c15_i32_11 = arith.constant 15 : i32
      %40 = tpu.dynamic_rotate %39 by %c15_i32_11 dim 0 : vector<16x16xf32>, i32 -> vector<16x16xf32>
      %41 = arith.addf %39, %40 : vector<16x16xf32>
      %c14_i32_12 = arith.constant 14 : i32
      %42 = tpu.dynamic_rotate %39 by %c14_i32_12 dim 0 : vector<16x16xf32>, i32 -> vector<16x16xf32>
      %43 = arith.addf %41, %42 : vector<16x16xf32>
      %44 = vector.extract_strided_slice %43 {offsets = [0, 0], sizes = [16, 14], strides = [1, 1]} : vector<16x16xf32> to vector<16x14xf32>
      %45 = vector.extract_strided_slice %43 {offsets = [0, 1], sizes = [16, 14], strides = [1, 1]} : vector<16x16xf32> to vector<16x14xf32>
      %46 = arith.addf %44, %45 : vector<16x14xf32>
      %47 = vector.extract_strided_slice %43 {offsets = [0, 2], sizes = [16, 14], strides = [1, 1]} : vector<16x16xf32> to vector<16x14xf32>
      %48 = arith.addf %46, %47 : vector<16x14xf32>
      %49 = arith.mulf %20, %20 : vector<16x16xf32>
      %c15_i32_13 = arith.constant 15 : i32
      %50 = tpu.dynamic_rotate %49 by %c15_i32_13 dim 0 : vector<16x16xf32>, i32 -> vector<16x16xf32>
      %51 = arith.addf %49, %50 : vector<16x16xf32>
      %c14_i32_14 = arith.constant 14 : i32
      %52 = tpu.dynamic_rotate %49 by %c14_i32_14 dim 0 : vector<16x16xf32>, i32 -> vector<16x16xf32>
      %53 = arith.addf %51, %52 : vector<16x16xf32>
      %54 = vector.extract_strided_slice %53 {offsets = [0, 0], sizes = [16, 14], strides = [1, 1]} : vector<16x16xf32> to vector<16x14xf32>
      %55 = vector.extract_strided_slice %53 {offsets = [0, 1], sizes = [16, 14], strides = [1, 1]} : vector<16x16xf32> to vector<16x14xf32>
      %56 = arith.addf %54, %55 : vector<16x14xf32>
      %57 = vector.extract_strided_slice %53 {offsets = [0, 2], sizes = [16, 14], strides = [1, 1]} : vector<16x16xf32> to vector<16x14xf32>
      %58 = arith.addf %56, %57 : vector<16x14xf32>
      %59 = arith.mulf %17, %20 : vector<16x16xf32>
      %c15_i32_15 = arith.constant 15 : i32
      %60 = tpu.dynamic_rotate %59 by %c15_i32_15 dim 0 : vector<16x16xf32>, i32 -> vector<16x16xf32>
      %61 = arith.addf %59, %60 : vector<16x16xf32>
      %c14_i32_16 = arith.constant 14 : i32
      %62 = tpu.dynamic_rotate %59 by %c14_i32_16 dim 0 : vector<16x16xf32>, i32 -> vector<16x16xf32>
      %63 = arith.addf %61, %62 : vector<16x16xf32>
      %64 = vector.extract_strided_slice %63 {offsets = [0, 0], sizes = [16, 14], strides = [1, 1]} : vector<16x16xf32> to vector<16x14xf32>
      %65 = vector.extract_strided_slice %63 {offsets = [0, 1], sizes = [16, 14], strides = [1, 1]} : vector<16x16xf32> to vector<16x14xf32>
      %66 = arith.addf %64, %65 : vector<16x14xf32>
      %67 = vector.extract_strided_slice %63 {offsets = [0, 2], sizes = [16, 14], strides = [1, 1]} : vector<16x16xf32> to vector<16x14xf32>
      %68 = arith.addf %66, %67 : vector<16x14xf32>
      %cst_17 = arith.constant 0.111111112 : f32
      %69 = vector.broadcast %cst_17 : f32 to vector<16x14xf32>
      %70 = arith.mulf %29, %69 : vector<16x14xf32>
      %cst_18 = arith.constant 0.111111112 : f32
      %71 = vector.broadcast %cst_18 : f32 to vector<16x14xf32>
      %72 = arith.mulf %38, %71 : vector<16x14xf32>
      %cst_19 = arith.constant 0.111111112 : f32
      %73 = vector.broadcast %cst_19 : f32 to vector<16x14xf32>
      %74 = arith.mulf %48, %73 : vector<16x14xf32>
      %75 = arith.mulf %70, %70 : vector<16x14xf32>
      %76 = arith.subf %74, %75 : vector<16x14xf32>
      %cst_20 = arith.constant 1.125000e+00 : f32
      %77 = vector.broadcast %cst_20 : f32 to vector<16x14xf32>
      %78 = arith.mulf %77, %76 : vector<16x14xf32>
      %cst_21 = arith.constant 0.111111112 : f32
      %79 = vector.broadcast %cst_21 : f32 to vector<16x14xf32>
      %80 = arith.mulf %58, %79 : vector<16x14xf32>
      %81 = arith.mulf %72, %72 : vector<16x14xf32>
      %82 = arith.subf %80, %81 : vector<16x14xf32>
      %cst_22 = arith.constant 1.125000e+00 : f32
      %83 = vector.broadcast %cst_22 : f32 to vector<16x14xf32>
      %84 = arith.mulf %83, %82 : vector<16x14xf32>
      %cst_23 = arith.constant 0.111111112 : f32
      %85 = vector.broadcast %cst_23 : f32 to vector<16x14xf32>
      %86 = arith.mulf %68, %85 : vector<16x14xf32>
      %87 = arith.mulf %70, %72 : vector<16x14xf32>
      %88 = arith.subf %86, %87 : vector<16x14xf32>
      %cst_24 = arith.constant 1.125000e+00 : f32
      %89 = vector.broadcast %cst_24 : f32 to vector<16x14xf32>
      %90 = arith.mulf %89, %88 : vector<16x14xf32>
      %cst_25 = arith.constant 2.000000e+00 : f32
      %91 = vector.broadcast %cst_25 : f32 to vector<16x14xf32>
      %92 = arith.mulf %91, %70 : vector<16x14xf32>
      %93 = arith.mulf %92, %72 : vector<16x14xf32>
      %cst_26 = arith.constant 9.99999974E-5 : f32
      %94 = vector.broadcast %cst_26 : f32 to vector<16x14xf32>
      %95 = arith.addf %93, %94 : vector<16x14xf32>
      %cst_27 = arith.constant 2.000000e+00 : f32
      %96 = vector.broadcast %cst_27 : f32 to vector<16x14xf32>
      %97 = arith.mulf %96, %90 : vector<16x14xf32>
      %cst_28 = arith.constant 8.99999984E-4 : f32
      %98 = vector.broadcast %cst_28 : f32 to vector<16x14xf32>
      %99 = arith.addf %97, %98 : vector<16x14xf32>
      %100 = arith.mulf %70, %70 : vector<16x14xf32>
      %101 = arith.mulf %72, %72 : vector<16x14xf32>
      %102 = arith.addf %100, %101 : vector<16x14xf32>
      %cst_29 = arith.constant 9.99999974E-5 : f32
      %103 = vector.broadcast %cst_29 : f32 to vector<16x14xf32>
      %104 = arith.addf %102, %103 : vector<16x14xf32>
      %105 = arith.addf %78, %84 : vector<16x14xf32>
      %cst_30 = arith.constant 8.99999984E-4 : f32
      %106 = vector.broadcast %cst_30 : f32 to vector<16x14xf32>
      %107 = arith.addf %105, %106 : vector<16x14xf32>
      %108 = arith.mulf %104, %107 : vector<16x14xf32>
      %109 = tpu.reciprocal %108 {approx = true} : vector<16x14xf32> -> vector<16x14xf32>
      %110 = arith.mulf %108, %109 : vector<16x14xf32>
      %cst_31 = arith.constant 2.000000e+00 : f32
      %111 = vector.broadcast %cst_31 : f32 to vector<16x14xf32>
      %112 = arith.subf %111, %110 : vector<16x14xf32>
      %113 = arith.mulf %109, %112 : vector<16x14xf32>
      %114 = arith.mulf %95, %99 : vector<16x14xf32>
      %115 = arith.mulf %114, %113 : vector<16x14xf32>
      %116 = arith.mulf %115, %8 : vector<16x14xf32>
      %117 = vector.shape_cast %116 : vector<16x14xf32> to vector<1x16x14xf32>
      %cst_32 = arith.constant dense<0.000000e+00> : vector<1xf32>
      %118 = vector.multi_reduction <add>, %117, %cst_32 [1, 2] : vector<1x16x14xf32> to vector<1xf32>
      %119 = vector.shape_cast %118 : vector<1xf32> to vector<1x1x1xf32>
      %120 = vector.extract %119[0, 0, 0] : f32 from vector<1x1x1xf32>
      %121 = vector.broadcast %120 : f32 to vector<1x1xf32>
      %122 = arith.addf %arg5, %121 : vector<1x1xf32>
      scf.yield %122 : vector<1x1xf32>
    }
    %c4_i32_1 = arith.constant 4 : i32
    %12 = vector.extract %11[0, 0] : f32 from vector<1x1xf32>
    %13 = vector.broadcast %12 : f32 to vector<1x8x128xf32>
    %c0 = arith.constant 0 : index
    %c0_2 = arith.constant 0 : index
    %c0_3 = arith.constant 0 : index
    %14 = vector.load %arg3[%c0, %c0_2, %c0_3] : memref<1x8x128xf32, #tpu.memory_space<vmem>>, vector<1x8x128xf32>
    tpu.vector_store %arg3[%c0, %c0_2, %c0_3], %13 {strides = array<i32>} : memref<1x8x128xf32, #tpu.memory_space<vmem>>, vector<1x8x128xf32>,
    return
  }
  func.func @transform_0(%arg0: i32) -> (i32, i32, i32) {
    %c0_i32 = arith.constant 0 : i32
    %c0_i32_0 = arith.constant 0 : i32
    %c0_i32_1 = arith.constant 0 : i32
    return %arg0, %c0_i32, %c0_i32_0 : i32, i32, i32
  }
  func.func @transform_1(%arg0: i32) -> (i32, i32, i32) {
    %c0_i32 = arith.constant 0 : i32
    %c0_i32_0 = arith.constant 0 : i32
    %c0_i32_1 = arith.constant 0 : i32
    return %arg0, %c0_i32, %c0_i32_0 : i32, i32, i32
  }
  func.func @transform_2(%arg0: i32) -> (i32, i32, i32) {
    %c0_i32 = arith.constant 0 : i32
    %c0_i32_0 = arith.constant 0 : i32
    %c0_i32_1 = arith.constant 0 : i32
    return %arg0, %c0_i32, %c0_i32_0 : i32, i32, i32
  }
}

</mosaic_0001>

<bundles_post_ra>
// kernel: tpu_custom_call.1
= control target key start
LH: loop header
LB: loop body
LE: loop exit
PB: predicated region body
PF: predicated region fallthrough
CT: control target
= control target key end

     0   :  { %7 = vsyncpa [#allocation3], 0  ;;  %s1216_s0 = inlined_call_operand.hbm [shape: f32[8,16,16], index: 0, kind: input, shape index: {}]   ;;  %s1217_s1 = inlined_call_operand.hbm [shape: f32[8,16,16], index: 1, kind: input, shape index: {}]   ;;  %s1218_s2 = inlined_call_operand.hbm [shape: f32[2,8,128], index: 2, kind: output, shape index: {}]  }
   0x1   :  { %9 = vsyncpa [#allocation3 + $0x1], 0 }
   0x2   :  { %10 = vsyncpa [#allocation6], 0 }
   0x3   :  { %12 = vsyncpa [#allocation6 + $0x1], 0 }
   0x4   :  { %13 = vsyncpa [#allocation4], 0 }
   0x5   :  { %15 = vsyncpa [#allocation4 + $0x1], 0  ;;  %s868_s9 = smov 0   ;;  %s870_s10 = smov 0  }
   0x6   :  { %s872_s11 = smov 0   ;;  %s874_s12 = smov 0  }
   0x7 LB: > { %s889_s13 = sadd.s32 4294967295, %s835_s12   ;;  %s591_s14 = sadd.s32 4294967294, %s835_s12   ;;  %s835_s12 = sphi %s874_s12, %s1235_s12   ;;  %s831_s11 = sphi %s872_s11, %s1234_s11   ;;  %s827_s10 = sphi %s870_s10, %s1233_s10   ;;  %s823_s9 = sphi %s868_s9, %s1232_s9  }
   0x8   : > { %s893_s15 = sadd.s32 1, %s835_s12   ;;  %s28_s16 = sadd.s32 1, %s831_s11 }
   0x9   : > { %s25_s17 = ssub.s32 %s835_s12, %s893_s15  ;;  %p35_p0 = scmp.ne.s32.totalorder %s831_s11, %s827_s10 }
   0xa   : > { %p26_p1 = scmp.eq.s32.totalorder %s25_s17, 0  ;;  %p36_p2 = scmp.eq.s32.totalorder %s835_s12, 0 }
   0xb   : > { %p41_p3 = scmp.ne.s32.totalorder %s827_s10, %s823_s9  ;;  %p42_p4 = scmp.eq.s32.totalorder %s889_s13, 0 }
   0xc   : > { %s905_s18 = scalar_select %p26_p1, %s831_s11, %s28_s16  }
   0xd   : > { %p907_p5 = por %p36_p2, %p35_p0  ;;  %p911_p6 = por %p42_p4, %p41_p3 }
   0xe   : > { %p91_p7 = scmp.eq.s32.totalorder %s889_s13, 1  ;;  %p97_p8 = scmp.eq.s32.totalorder %s591_s14, 1 }
   0xf   : > { %s1222_s20 = scalar_select %p911_p6, 1, 0 }
  0x10   : > { %p638_p10 = scmp.lt.s32.totalorder %s835_s12, 2  ;;  %p918_p11 = por %p91_p7, %p35_p0 }
  0x11   : > { %p922_p12 = por %p97_p8, %p41_p3  ;;  %s927_s23 = sand.u32 1, %s831_s11  }
  0x12   : > { %s1223_s21 = scalar_select %p918_p11, 1, 0 }
  0x13   : > { %s1224_s22 = scalar_select %p922_p12, 1, 0 }
  0x14   : > { %s614_s24 = sshll.u32 %s835_s12, 10  ;;  %s594_s25 = sshll.u32 %s927_s23, 6 }
  0x15   : > { %s936_s28 = scalar_lea.hbm %s1216_s0, %s614_s24  ;;  %s121_s29 = scalar_lea.vmem [#allocation2], %s594_s25 }
  0x16   : > { %s129_s30 = sshll.u32 %s121_s29, 4  ;;  %p942_p13 = pnand %p638_p10, %p907_p5  ;;  %s946_s30 = int_to_ptr.vmem [resolvable:$true] %s129_s30 }
  0x17   : > { %s118_s4 = scalar_lea.sflag [#allocation3], %s927_s23  ;;  %s697_s5 = scalar_lea.hbm %s936_s28, 1024 }
  0x18   : > { %p698_p0 = scmp.ne.s32.totalorder %s936_s28, %s697_s5  ;;  %p699_p1 = pneg %p942_p13 }
  0x19   : > { %s702_s8 = scalar_lea.hbm %s1216_s0, 2048  ;;  %p703_p4 = scmp.lt.u32.totalorder %s936_s28, %s1216_s0 }
  0x1a   : > { %p700_p2 = pnand %p699_p1, %p698_p0  ;;  %p704_p5 = scmp.lt.u32.totalorder %s702_s8, %s697_s5 }
  0x1b   : > { %p706_p8 = scmp.lt.u32.totalorder %s697_s5, %s936_s28 }
  0x1c   : > { %p701_p3 = pneg %p700_p2  ;;  %p705_p7 = por %p704_p5, %p703_p4 }
  0x1e   : > { %p707_p10 = por %p706_p8, %p705_p7 }
  0x20   : > { %p708_p9 = pnand %p707_p10, %p701_p3 }
  0x22   : > { %711 = shalt.err (!%p708_p9)
}
  0x23   : > { %s712_s17 = scalar_lea.vmem %s946_s30, 1024  ;;  %s845_s19 = smov [#allocation2]  }
  0x24   : > { %p713_p0 = scmp.ne.s32.totalorder %s946_s30, %s712_s17  ;;  %s717_s26 = sshll.u32 %s845_s19, 4  ;;  %s718_s26 = int_to_ptr.vmem [resolvable:$false] %s717_s26 }
  0x25   : > { %s719_s27 = scalar_lea.vmem %s718_s26, 2048  ;;  %p720_p11 = scmp.lt.s32.totalorder %s946_s30, %s718_s26 }
  0x26   : > { %p715_p2 = pnand %p713_p0, %p699_p1  ;;  %p721_p4 = scmp.lt.s32.totalorder %s719_s27, %s712_s17 }
  0x28   : > { %p716_p12 = pneg %p715_p2  ;;  %p722_p5 = por %p721_p4, %p720_p11 }
  0x2a   : > { %p723_p7 = pnand %p722_p5, %p716_p12 }
  0x2c   : > { %726 = shalt.err (!%p723_p7)
}
  0x2d   : > { %s846_s29 = smov 128   ;;  %s847_s5 = smov 8  }
  0x2e   : > { %630 = dma.hbm_to_vmem [thread:$0]  (!%p942_p13), %s936_s28, 1024, %s946_s30, %s118_s4, %s846_s29, %s846_s29, %s847_s5  }
  0x2f   : > { %p602_p9 = scmp.ge.s32.totalorder %s835_s12, 1  ;;  %p159_p11 = scmp.lt.s32.totalorder %s835_s12, 3 }
  0x30   : > { %s990_s14 = scalar_lea.hbm %s1217_s1, %s614_s24  ;;  %s143_s16 = scalar_lea.vmem [#allocation5], %s594_s25 }
  0x31   : > { %p981_p12 = pnand %p602_p9, %p159_p11  ;;  %s151_s17 = sshll.u32 %s143_s16, 4  ;;  %s994_s17 = int_to_ptr.vmem [resolvable:$true] %s151_s17 }
  0x32   : > { %s140_s28 = scalar_lea.sflag [#allocation6], %s927_s23  ;;  %s727_s30 = scalar_lea.hbm %s990_s14, 1024 }
  0x33   : > { %p728_p3 = scmp.ne.s32.totalorder %s990_s14, %s727_s30  ;;  %s732_s24 = scalar_lea.hbm %s1217_s1, 2048 }
  0x34   : > { %p733_p0 = scmp.lt.u32.totalorder %s990_s14, %s1217_s1  ;;  %p734_p2 = scmp.lt.u32.totalorder %s732_s24, %s727_s30 }
  0x35   : > { %p730_p8 = pnand %p728_p3, %p699_p1  ;;  %p736_p5 = scmp.lt.u32.totalorder %s727_s30, %s990_s14 }
  0x36   : > { %p735_p4 = por %p734_p2, %p733_p0 }
  0x37   : > { %p731_p10 = pneg %p730_p8 }
  0x38   : > { %p737_p7 = por %p736_p5, %p735_p4 }
  0x3a   : > { %p738_p9 = pnand %p737_p7, %p731_p10 }
  0x3c   : > { %741 = shalt.err (!%p738_p9)
}
  0x3d   : > { %s742_s25 = scalar_lea.vmem %s994_s17, 1024  ;;  %s848_s7 = smov [#allocation5]  }
  0x3e   : > { %p743_p11 = scmp.ne.s32.totalorder %s994_s17, %s742_s25  ;;  %s747_s8 = sshll.u32 %s848_s7, 4  ;;  %s748_s8 = int_to_ptr.vmem [resolvable:$false] %s747_s8 }
  0x3f   : > { %s749_s16 = scalar_lea.vmem %s748_s8, 2048  ;;  %p750_p6 = scmp.lt.s32.totalorder %s994_s17, %s748_s8 }
  0x40   : > { %p745_p3 = pnand %p743_p11, %p699_p1  ;;  %p751_p0 = scmp.lt.s32.totalorder %s749_s16, %s742_s25 }
  0x42   : > { %p746_p8 = pneg %p745_p3  ;;  %p752_p2 = por %p751_p0, %p750_p6 }
  0x44   : > { %p753_p4 = pnand %p752_p2, %p746_p8 }
  0x46   : > { %756 = shalt.err (!%p753_p4)
}
  0x47   : > { %633 = dma.hbm_to_vmem [thread:$0]  (!%p942_p13), %s990_s14, 1024, %s994_s17, %s140_s28, %s846_s29, %s846_s29, %s847_s5  }
  0x48   : > { %163 = sbr.rel (%p981_p12) target bundleno = 555 (0x22b), region = 28  ;;  %s1028_s30 = sand.u32 (!%p981_p12), 1, %s827_s10  }
  0x49   : > { %s603_s4 = sshll.u32 (!%p981_p12), %s1028_s30, 6  ;;  %s166_s19 = scalar_lea.sflag (!%p981_p12), [#allocation3], %s1028_s30 }
  0x4a   : > { %s1032_s3 = scalar_lea.vmem (!%p981_p12), [#allocation2], %s603_s4  ;;  %p1227_p6 = scmp.ne.s32.totalorder (!%p981_p12), %s1222_s20, 0 }
  0x4f   : > { %810 = dma.done.wait (%p1227_p6), %s166_s19, 1024  }
  0x50   : > { %812 = vsyncadd (%p1227_p6), %s166_s19, 4294966272  ;;  %s175_s23 = scalar_lea.sflag [#allocation6], %s1028_s30  ;;  %s1039_s29 = scalar_lea.vmem [#allocation5], %s603_s4 }
  0x51   : > { %814 = dma.done.wait (%p1227_p6), %s175_s23, 1024  }
  0x52   : > { %816 = vsyncadd (%p1227_p6), %s175_s23, 4294966272  ;;  %s605_s5 = sshll.u32 %s1028_s30, 3  ;;  %v206_v0 = vlaneseq  ;;  %v849_v4 = vmov 0.0   ;;  %v1055_v7 = vmov 0.0   ;;  %s1057_s20 = smov 0  }
  0x53   : > { %s1053_s6 = scalar_lea.vmem [#allocation7], %s605_s5 }
  0x54   : > { %v1046_v1 = vshrl.u32 %v206_v0, 7  ;;  %v210_v2 = vand.u32 127, %v206_v0 }
  0x56   : > { %v208_v3 = vadd.s32 8, %v1046_v1  ;;  %vm213_vm0 = vcmp.lt.s32.totalorder %v210_v2, 14 }
  0x57   : > { %v1049_v5 = vsel %vm213_vm0, 1.0, %v849_v4 }
  0x58   : > { %vm212_vm1 = vcmp.lt.s32.totalorder %v208_v3, 14 }
  0x59   : > { %vm215_vm2 = vmand %vm212_vm1, %vm213_vm0 }
  0x5a   : > { %v1051_v6 = vsel %vm215_vm2, 1.0, %v849_v4 }
  0x5b LB: >> { %s608_s14 = sshll.u32 %s843_s20, 4  ;;  %vm236_vm3 = vcmp.lt.s32.totalorder %v1046_v1, 7  ;;  %vm243_vm4 = vcmp.lt.s32.totalorder %v1046_v1, 6  ;;  %s850_s24 = smov 127   ;;  %vm454_vm5 = vcmask 113664   ;;  %s843_s20 = sphi %s1057_s20, %s225_s20   ;;  %v839_v7 = vphi %v1055_v7, %v1228_v7  }
  0x5c   : >> { %s231_s17 = scalar_lea.vmem %s1039_s29, %s608_s14 [#allocation5]  ;;  %s228_s28 = scalar_lea.vmem %s1032_s3, %s608_s14 [#allocation2] }
  0x5d   : >> { %v232_v8 = vld [vmem:[%s231_s17] sm:$0xff]  ;;  %v1068_v9 = vld [vmem:[%s231_s17 + $0x8] sm:$0xff]  ;;  %s851_s26 = smov 126   ;;  %s225_s20 = sadd.s32 1, %s843_s20  }
  0x5e   : >> { %v229_v10 = vld [vmem:[%s228_s28] sm:$0xff]  ;;  %v266_v11 = vrot.slane %v232_v8, 1  ;;  %v267_v12 = vrot.slane %v1068_v9, 1  ;;  %v272_v13 = vrot.slane %v232_v8, 2  ;;  %v273_v14 = vrot.slane %v1068_v9, 2  ;;  %v230_v15 = vld [vmem:[%s228_s28 + $0x8] sm:$0xff] }
  0x5f   : >> { %v234_v16 = vrot.slane %v229_v10, 1  ;;  %v235_v17 = vrot.slane %v230_v15, 1  ;;  %v241_v18 = vrot.slane %v229_v10, 2  ;;  %v242_v19 = vrot.slane %v230_v15, 2  ;;  %p222_p13 = scmp.ge.s32.totalorder %s225_s20, 4  }
  0x60   : >> { %v268_v20 = vsel %vm236_vm3, %v266_v11, %v267_v12  ;;  %v274_v21 = vsel %vm243_vm4, %v272_v13, %v273_v14  ;;  %v269_v22 = vsel %vm236_vm3, %v267_v12, %v266_v11  ;;  %v275_v28 = vsel %vm243_vm4, %v273_v14, %v272_v13  ;;  %s610_s25 = sshll.u32 (%p222_p13), %s889_s13, 7  ;;  %s486_s7 = sshll.u32 (%p222_p13), %s1053_s6, 4  ;;  %s1173_s7 = int_to_ptr.vmem [resolvable:$true] %s486_s7 }
  0x61   : >> { %v270_v23 = vadd.f32 %v268_v20, %v232_v8  ;;  %v237_v24 = vsel %vm236_vm3, %v234_v16, %v235_v17  ;;  %v244_v25 = vsel %vm243_vm4, %v241_v18, %v242_v19  ;;  %v271_v26 = vadd.f32 %v269_v22, %v1068_v9  ;;  %s1171_s4 = scalar_lea.hbm (%p222_p13), %s1218_s2, %s610_s25  ;;  %s473_s3 = scalar_lea.sflag (%p222_p13), [#allocation4], %s1028_s30 }
  0x62   : >> { %v239_v27 = vadd.f32 %v237_v24, %v229_v10  ;;  %v238_v29 = vsel %vm236_vm3, %v235_v17, %v234_v16  ;;  %v296_v30 = vmul.f32 %v229_v10, %v229_v10  ;;  %v245_v33 = vsel %vm243_vm4, %v242_v19, %v241_v18  ;;  %s757_s23 = scalar_lea.vmem (%p222_p13), %s1173_s7, 128  ;;  %p1229_p12 = scmp.ne.s32.totalorder (%p222_p13), %s1223_s21, 0 }
  0x63   : >> { %v1089_v31 = vadd.f32 %v274_v21, %v270_v23  ;;  %v240_v32 = vadd.f32 %v238_v29, %v230_v15  ;;  %v297_v34 = vmul.f32 %v230_v15, %v230_v15  ;;  %v1097_v36 = vadd.f32 %v275_v28, %v271_v26  ;;  %p758_p1 = scmp.ne.s32.totalorder (%p222_p13), %s1173_s7, %s757_s23  ;;  %s852_s13 = smov (%p222_p13), [#allocation7]  }
  0x64   : >> { %v1093_v35 = vadd.f32 %v244_v25, %v239_v27  ;;  %v298_v37 = vrot.slane %v296_v30, 1  ;;  %v328_v40 = vmul.f32 %v232_v8, %v232_v8  ;;  %v329_v41 = vmul.f32 %v1068_v9, %v1068_v9  ;;  %s761_s29 = sshll.u32 (%p222_p13), %s852_s13, 4  ;;  %s762_s29 = int_to_ptr.vmem [resolvable:$false] %s761_s29 }
  0x65   : >> { %280 = vrot.lane.b32.xlu1 %v1089_v31, %s850_s24  ;;  %v1101_v38 = vadd.f32 %v245_v33, %v240_v32  ;;  %v299_v39 = vrot.slane %v297_v34, 1  ;;  %v304_v42 = vrot.slane %v296_v30, 2  ;;  %v305_v44 = vrot.slane %v297_v34, 2  ;;  %p759_p10 = pnand (%p222_p13), %p758_p1, %p1229_p12  ;;  %s763_s5 = scalar_lea.vmem (%p222_p13), %s762_s29, 256 }
  0x66   : >> { %250 = vrot.lane.b32.xlu0 %v1093_v35, %s850_s24  ;;  %v330_v45 = vrot.slane %v328_v40, 1  ;;  %v331_v46 = vrot.slane %v329_v41, 1  ;;  %v336_v49 = vrot.slane %v328_v40, 2  ;;  %v337_v53 = vrot.slane %v329_v41, 2  ;;  %p764_p7 = scmp.lt.s32.totalorder (%p222_p13), %s1173_s7, %s762_s29  ;;  %p765_p9 = scmp.lt.s32.totalorder (%p222_p13), %s763_s5, %s757_s23 }
  0x67   : >> { %v301_v43 = vsel %vm236_vm3, %v299_v39, %v298_v37  ;;  %v300_v47 = vsel %vm236_vm3, %v298_v37, %v299_v39  ;;  %v307_v50 = vsel %vm243_vm4, %v305_v44, %v304_v42  ;;  %v306_v54 = vsel %vm243_vm4, %v304_v42, %v305_v44  ;;  %p760_p5 = pneg (%p222_p13), %p759_p10 }
  0x68   : >> { %v303_v48 = vadd.f32 %v301_v43, %v297_v34  ;;  %v302_v51 = vadd.f32 %v300_v47, %v296_v30  ;;  %v333_v52 = vsel %vm236_vm3, %v331_v46, %v330_v45  ;;  %v332_v55 = vsel %vm236_vm3, %v330_v45, %v331_v46  ;;  %p766_p11 = por (%p222_p13), %p765_p9, %p764_p7 }
  0x69   : >> { %282 = vrot.lane.b32.xlu1 %v1097_v36, %s850_s24  ;;  %v335_v57 = vadd.f32 %v333_v52, %v329_v41  ;;  %v360_v58 = vmul.f32 %v232_v8, %v229_v10  ;;  %v339_v60 = vsel %vm243_vm4, %v337_v53, %v336_v49  ;;  %v334_v61 = vadd.f32 %v332_v55, %v328_v40 }
  0x6a   : >> { %252 = vrot.lane.b32.xlu0 %v1101_v38, %s850_s24  ;;  %v309_v56 = vadd.f32 %v307_v50, %v303_v48  ;;  %v308_v59 = vadd.f32 %v306_v54, %v302_v51  ;;  %v361_v62 = vmul.f32 %v1068_v9, %v230_v15  ;;  %v338_v63 = vsel %vm243_vm4, %v336_v49, %v337_v53  ;;  %p767_p3 = pnand (%p222_p13), %p766_p11, %p760_p5 }
  0x6b   : >> { %v341_v0 = vadd.f32 %v339_v60, %v335_v57  ;;  %v340_v2 = vadd.f32 %v338_v63, %v334_v61  ;;  %v362_v3 = vrot.slane %v360_v58, 1  ;;  %v368_v10 = vrot.slane %v360_v58, 2 }
  0x6c   : >> { %v363_v4 = vrot.slane %v361_v62, 1  ;;  %v369_v9 = vrot.slane %v361_v62, 2 }
  0x6d   : >> { %260 = vrot.lane.b32.xlu1 %v1101_v38, %s851_s26 }
  0x6e   : >> { %258 = vrot.lane.b32.xlu0 %v1093_v35, %s851_s26  ;;  %v365_v8 = vsel %vm236_vm3, %v363_v4, %v362_v3  ;;  %v364_v11 = vsel %vm236_vm3, %v362_v3, %v363_v4  ;;  %v371_v13 = vsel %vm243_vm4, %v369_v9, %v368_v10  ;;  %v370_v15 = vsel %vm243_vm4, %v368_v10, %v369_v9 }
  0x6f   : >> { %v367_v12 = vadd.f32 %v365_v8, %v361_v62  ;;  %v366_v14 = vadd.f32 %v364_v11, %v360_v58 }
  0x71   : >> { %290 = vrot.lane.b32.xlu1 %v1097_v36, %s851_s26  ;;  %v373_v16 = vadd.f32 %v371_v13, %v367_v12  ;;  %v372_v17 = vadd.f32 %v370_v15, %v366_v14 }
  0x72   : >> { %288 = vrot.lane.b32.xlu0 %v1089_v31, %s851_s26 }
  0x75   : >> { %314 = vrot.lane.b32.xlu1 %v309_v56, %s850_s24 }
  0x76   : >> { %312 = vrot.lane.b32.xlu0 %v308_v59, %s850_s24 }
  0x79   : >> { %346 = vrot.lane.b32.xlu1 %v341_v0, %s850_s24 }
  0x7a   : >> { %344 = vrot.lane.b32.xlu0 %v340_v2, %s850_s24 }
  0x7d   : >> { %322 = vrot.lane.b32.xlu1 %v309_v56, %s851_s26 }
  0x7e   : >> { %320 = vrot.lane.b32.xlu0 %v308_v59, %s851_s26 }
  0x81   : >> { %354 = vrot.lane.b32.xlu1 %v341_v0, %s851_s26 }
  0x82   : >> { %352 = vrot.lane.b32.xlu0 %v340_v2, %s851_s26 }
  0x85   : >> { %378 = vrot.lane.b32.xlu1 %v373_v16, %s850_s24 }
  0x86   : >> { %376 = vrot.lane.b32.xlu0 %v372_v17, %s850_s24 }
  0x89   : >> { %386 = vrot.lane.b32.xlu1 %v373_v16, %s851_s26 }
  0x8a   : >> { %384 = vrot.lane.b32.xlu0 %v372_v17, %s851_s26 }
  0xd7   : >> { %v281_v18 = vpop.permute.xlu1 %280 }
  0xd8   : >> { %v251_v19 = vpop.permute.xlu0 %250  ;;  %v286_v37 = vadd.f32 %v281_v18, %v1089_v31 }
  0xd9   : >> { %v256_v29 = vadd.f32 %v251_v19, %v1093_v35 }
  0xdb   : >> { %v283_v20 = vpop.permute.xlu1 %282 }
  0xdc   : >> { %v253_v21 = vpop.permute.xlu0 %252  ;;  %v287_v32 = vadd.f32 %v283_v20, %v1097_v36 }
  0xdd   : >> { %v257_v28 = vadd.f32 %v253_v21, %v1101_v38 }
  0xdf   : >> { %v261_v22 = vpop.permute.xlu1 %260 }
  0xe0   : >> { %v259_v23 = vpop.permute.xlu0 %258  ;;  %v265_v33 = vadd.f32 %v261_v22, %v257_v28 }
  0xe1   : >> { %v264_v39 = vadd.f32 %v259_v23, %v256_v29 }
  0xe2   : >> { %v393_v45 = vmul.f32 0.11111111, %v265_v33 }
  0xe3   : >> { %v291_v24 = vpop.permute.xlu1 %290  ;;  %v392_v48 = vmul.f32 0.11111111, %v264_v39 }
  0xe4   : >> { %v289_v25 = vpop.permute.xlu0 %288  ;;  %v295_v40 = vadd.f32 %v291_v24, %v287_v32  ;;  %v399_v54 = vmul.f32 %v393_v45, %v393_v45 }
  0xe5   : >> { %v294_v42 = vadd.f32 %v289_v25, %v286_v37  ;;  %v398_v57 = vmul.f32 %v392_v48, %v392_v48 }
  0xe6   : >> { %v395_v49 = vmul.f32 0.11111111, %v295_v40  ;;  %v421_v40 = vmul.f32 2.0, %v393_v45 }
  0xe7   : >> { %v315_v26 = vpop.permute.xlu1 %314  ;;  %v394_v51 = vmul.f32 0.11111111, %v294_v42  ;;  %v420_v42 = vmul.f32 2.0, %v392_v48 }
  0xe8   : >> { %v313_v27 = vpop.permute.xlu0 %312  ;;  %v319_v41 = vadd.f32 %v315_v26, %v309_v56  ;;  %v415_v28 = vmul.f32 %v395_v49, %v393_v45 }
  0xe9   : >> { %v318_v43 = vadd.f32 %v313_v27, %v308_v59  ;;  %v407_v59 = vmul.f32 %v395_v49, %v395_v49  ;;  %v406_v62 = vmul.f32 %v394_v51, %v394_v51 }
  0xeb   : >> { %v347_v30 = vpop.permute.xlu1 %346  ;;  %v431_v12 = vadd.f32 %v407_v59, %v399_v54  ;;  %v430_v14 = vadd.f32 %v406_v62, %v398_v57 }
  0xec   : >> { %v345_v34 = vpop.permute.xlu0 %344  ;;  %v351_v35 = vadd.f32 %v347_v30, %v341_v0  ;;  %v414_v30 = vmul.f32 %v394_v51, %v392_v48 }
  0xed   : >> { %v350_v36 = vadd.f32 %v345_v34, %v340_v2  ;;  %v433_v24 = vadd.f32 0.0001, %v431_v12  ;;  %v432_v27 = vadd.f32 0.0001, %v430_v14 }
  0xef   : >> { %v323_v44 = vpop.permute.xlu1 %322 }
  0xf0   : >> { %v327_v46 = vadd.f32 %v323_v44, %v319_v41  ;;  %v321_v47 = vpop.permute.xlu0 %320  ;;  %v423_v44 = vmul.f32 %v421_v40, %v395_v49 }
  0xf1   : >> { %v326_v38 = vadd.f32 %v321_v47, %v318_v43  ;;  %v422_v47 = vmul.f32 %v420_v42, %v394_v51 }
  0xf2   : >> { %v397_v50 = vmul.f32 0.11111111, %v327_v46 }
  0xf3   : >> { %v396_v52 = vmul.f32 0.11111111, %v326_v38  ;;  %v355_v53 = vpop.permute.xlu1 %354 }
  0xf4   : >> { %v359_v31 = vadd.f32 %v355_v53, %v351_v35  ;;  %v353_v55 = vpop.permute.xlu0 %352  ;;  %v401_v58 = vsub.f32 %v397_v50, %v399_v54  ;;  %v425_v53 = vadd.f32 0.0001, %v423_v44 }
  0xf5   : >> { %v358_v56 = vadd.f32 %v353_v55, %v350_v36  ;;  %v400_v61 = vsub.f32 %v396_v52, %v398_v57 }
  0xf6   : >> { %v405_v60 = vmul.f32 0.11111111, %v359_v31  ;;  %v403_v2 = vmul.f32 1.125, %v401_v58  ;;  %v424_v31 = vadd.f32 0.0001, %v422_v47 }
  0xf7   : >> { %v404_v63 = vmul.f32 0.11111111, %v358_v56  ;;  %v379_v3 = vpop.permute.xlu1 %378  ;;  %v402_v13 = vmul.f32 1.125, %v400_v61 }
  0xf8   : >> { %v409_v4 = vsub.f32 %v405_v60, %v407_v59  ;;  %v383_v8 = vadd.f32 %v379_v3, %v373_v16  ;;  %v377_v0 = vpop.permute.xlu0 %376 }
  0xf9   : >> { %v408_v10 = vsub.f32 %v404_v63, %v406_v62  ;;  %v382_v9 = vadd.f32 %v377_v0, %v372_v17 }
  0xfa   : >> { %v411_v11 = vmul.f32 1.125, %v409_v4 }
  0xfb   : >> { %v410_v15 = vmul.f32 1.125, %v408_v10  ;;  %v387_v18 = vpop.permute.xlu1 %386 }
  0xfc   : >> { %v435_v19 = vadd.f32 %v411_v11, %v403_v2  ;;  %v391_v20 = vadd.f32 %v387_v18, %v383_v8  ;;  %v385_v21 = vpop.permute.xlu0 %384 }
  0xfd   : >> { %v434_v22 = vadd.f32 %v410_v15, %v402_v13  ;;  %v390_v23 = vadd.f32 %v385_v21, %v382_v9 }
  0xfe   : >> { %v437_v25 = vadd.f32 0.0009, %v435_v19  ;;  %v413_v26 = vmul.f32 0.11111111, %v391_v20 }
  0xff   : >> { %v436_v16 = vadd.f32 0.0009, %v434_v22  ;;  %v412_v29 = vmul.f32 0.11111111, %v390_v23 }
 0x100   : >> { %v439_v17 = vmul.f32 %v437_v25, %v433_v24  ;;  %v417_v33 = vsub.f32 %v413_v26, %v415_v28 }
 0x101   : >> { %v438_v32 = vmul.f32 %v436_v16, %v432_v27  ;;  %v416_v34 = vsub.f32 %v412_v29, %v414_v30 }
 0x102   : >> { %693 = vrcp.f32 %v439_v17  ;;  %v419_v37 = vmul.f32 1.125, %v417_v33 }
 0x103   : >> { %695 = vrcp.f32 %v438_v32  ;;  %v418_v39 = vmul.f32 1.125, %v416_v34 }
 0x104   : >> { %v427_v41 = vmul.f32 2.0, %v419_v37 }
 0x105   : >> { %v426_v43 = vmul.f32 2.0, %v418_v39 }
 0x106   : >> { %v429_v35 = vadd.f32 0.0009, %v427_v41 }
 0x107   : >> { %v428_v36 = vadd.f32 0.0009, %v426_v43 }
 0x108   : >> { %v449_v57 = vmul.f32 %v429_v35, %v425_v53 }
 0x109   : >> { %v448_v58 = vmul.f32 %v428_v36, %v424_v31 }
 0x10c   : >> { %v694_v46 = vpop.eup %693 }
 0x10d   : >> { %v696_v38 = vpop.eup %695  ;;  %v443_v50 = vmul.f32 %v694_v46, %v439_v17 }
 0x10e   : >> { %v442_v52 = vmul.f32 %v696_v38, %v438_v32 }
 0x10f   : >> { %v445_v54 = vsub.f32 2.0, %v443_v50 }
 0x110   : >> { %v444_v55 = vsub.f32 2.0, %v442_v52 }
 0x111   : >> { %v447_v56 = vmul.f32 %v694_v46, %v445_v54 }
 0x112   : >> { %v446_v59 = vmul.f32 %v696_v38, %v444_v55 }
 0x113   : >> { %v451_v45 = vmul.f32 %v449_v57, %v447_v56 }
 0x114   : >> { %v450_v60 = vmul.f32 %v448_v58, %v446_v59 }
 0x115   : >> { %v453_v48 = vmul.f32 %v1051_v6, %v451_v45 }
 0x116   : >> { %v452_v49 = vmul.f32 %v1049_v5, %v450_v60 }
 0x117   : >> { %v456_v51 = vsel %vm454_vm5, %v453_v48, 0.0 }
 0x118   : >> { %v455_v61 = vsel %vm454_vm5, %v452_v49, 0.0 }
 0x119   : >> { %v457_v62 = vadd.f32 %v456_v51, %v455_v61 }
 0x11b   : >> { %458 = vadd.xlane.f32.xlu0 %v457_v62 }
 0x1a8   : >> { %v459_v63 = vpop.xlane.xlu0 %458 }
 0x1a9   : >> { %v460_v3 = vrot.slane %v459_v63, 4 }
 0x1ab   : >> { %v461_v4 = vadd.f32 %v460_v3, %v459_v63 }
 0x1ad   : >> { %v462_v8 = vrot.slane %v461_v4, 2 }
 0x1af   : >> { %v463_v0 = vadd.f32 %v462_v8, %v461_v4 }
 0x1b1   : >> { %v464_v10 = vrot.slane %v463_v0, 1 }
 0x1b3   : >> { %v465_v9 = vadd.f32 %v464_v10, %v463_v0 }
 0x1b5   : >> { %617 = vpush %v465_v9 }
 0x1e4   : > { %224 = sbr.rel (!%p222_p13) target bundleno = 91 (0x5b), region = 95 }
 0x1e6   : >> { %s618_s27 = spop %617 }
 0x1e7   : >> { %v467_v2 = vstv %s618_s27 }
 0x1e8   : >> { %v468_v11 = vadd.f32 %v839_v7, %v467_v2  }
 0x1ea   : >> { %v1228_v7 = vmov %v468_v11  ;;  %619 = vpush (%p222_p13), %v468_v11 }
 0x21b   : > { %s620_s19 = spop %619 }
 0x21c   : > { %v470_v7 = vstv %s620_s19 }
 0x21d   : > { %471 = vst [vmem:[%s1053_s6] sm:$0xff] %v470_v7 }
 0x21e   : > { %770 = shalt.err (!%p767_p3)
}
 0x21f   : > { %s771_s30 = scalar_lea.hbm %s1171_s4, 128  ;;  %s775_s14 = scalar_lea.hbm %s1218_s2, 256 }
 0x220   : > { %p772_p8 = scmp.ne.s32.totalorder %s1171_s4, %s771_s30  ;;  %p776_p4 = scmp.lt.u32.totalorder %s1171_s4, %s1218_s2 }
 0x221   : > { %p777_p6 = scmp.lt.u32.totalorder %s775_s14, %s771_s30  ;;  %p779_p1 = scmp.lt.u32.totalorder %s771_s30, %s1171_s4 }
 0x222   : > { %p773_p0 = pnand %p772_p8, %p1229_p12 }
 0x223   : > { %p778_p13 = por %p777_p6, %p776_p4 }
 0x224   : > { %p774_p2 = pneg %p773_p0 }
 0x225   : > { %p780_p10 = por %p779_p1, %p778_p13 }
 0x227   : > { %p781_p5 = pnand %p780_p10, %p774_p2 }
 0x229   : > { %784 = shalt.err (!%p781_p5)
}
 0x22a   : > { %625 = dma.vmem_to_hbm [thread:$0]  (%p1229_p12), %s1173_s7, 128, %s1171_s4, %s473_s3  }
 0x22b PF: > { %s498_s24 = sand.u32 1, %s823_s9   ;;  %p1230_p7 = scmp.ne.s32.totalorder %s1224_s22, 0 }
 0x22c   : > { %p1231_p9 = scmp.ge.s32.totalorder %s835_s12, 2  ;;  %s499_s26 = scalar_lea.sflag [#allocation4], %s498_s24 }
 0x22e   : > { %p635_p11 = pnand %p1231_p9, %p1230_p7 }
 0x230   : > { %818 = dma.done.wait (!%p635_p11), %s499_s26, 128  }
 0x231   : > { %820 = vsyncadd (!%p635_p11), %s499_s26, 4294967168  ;;  %p18_p3 = scmp.ge.s32.totalorder %s893_s15, 4   ;;  %s1232_s9 = smov %s827_s10 }
 0x232   : > { %s1233_s10 = smov %s831_s11  ;;  %s1234_s11 = smov %s905_s18 }
 0x233   : > { %s1235_s12 = smov %s893_s15  ;;  %20 = sbr.rel (!%p18_p3) target bundleno = 7 (0x7), region = 106 }
 0x23a   :  { %504 = vsyncpa [#allocation3], 1 }
 0x23b   :  { %506 = vsyncpa [#allocation3 + $0x1], 1 }
 0x23c   :  { %507 = vsyncpa [#allocation6], 1 }
 0x23d   :  { %509 = vsyncpa [#allocation6 + $0x1], 1 }
 0x23e   :  { %510 = vsyncpa [#allocation4], 1 }
 0x23f   :  { %512 = vsyncpa [#allocation4 + $0x1], 1 }

</bundles_post_ra>
